<compile_context>
chip_gen: v6e
topology: v6e:2x2x1
jax: 0.10.0
libtpu: 0.0.40
codegen_flags: <defaults>
</compile_context>

<pallas_src>
import jax
import jax.numpy as jnp
from jax.experimental import pallas as pl
from jax.experimental.pallas import tpu as pltpu

# Deterministic "parameter" init (module __init__ takes a scalar `weight`).
WEIGHT = 0.7


def _round_up(x, m):
    return ((x + m - 1) // m) * m


def _round_down(x, m):
    return (x // m) * m


def _make_kernel(n_rows, tile_n, needs_mask):
    """Kernel computing per-tile unnormalized sums. No captured array consts:
    n_rows / tile_n / needs_mask are plain Python scalars."""

    def kernel(lf_ref, lc_ref, tgt_ref, pt_ref, tt_ref, o_ref):
        i = pl.program_id(0)

        tgt = tgt_ref[...]                 # (tile_n, 2) int32
        tgt_feat_col = tgt[:, 0:1]         # (tile_n, 1)
        tgt_class_col = tgt[:, 1:2]        # (tile_n, 1)

        if needs_mask:
            row = jax.lax.broadcasted_iota(jnp.int32, (tile_n, 1), 0)
            valid = (i * tile_n + row) < n_rows   # (tile_n, 1) bool
        else:
            valid = None

        def ce_sum(logits_ref, tgt_col):
            logits = logits_ref[...].astype(jnp.float32)
            m = jnp.max(logits, axis=-1, keepdims=True)
            x = logits - m                           # shifted logits, reused
            lse_s = jnp.log(jnp.sum(jnp.exp(x), axis=-1, keepdims=True))
            col = jax.lax.broadcasted_iota(jnp.int32, x.shape, 1)
            picked_s = jnp.sum(jnp.where(col == tgt_col, x, 0.0),
                               axis=-1, keepdims=True)
            contrib = lse_s - picked_s               # (tile_n, 1); m cancels
            if valid is not None:
                # Row-level select discards any NaN/inf from padded rows.
                contrib = jnp.where(valid, contrib, 0.0)
            return jnp.sum(contrib)

        sum_feat = ce_sum(lf_ref, tgt_feat_col)
        sum_class = ce_sum(lc_ref, tgt_class_col)

        diff = pt_ref[...].astype(jnp.float32) - tt_ref[...].astype(jnp.float32)
        row_sq = jnp.sum(diff * diff, axis=-1, keepdims=True)   # (tile_n, 1)
        if valid is not None:
            row_sq = jnp.where(valid, row_sq, 0.0)
        sum_thresh = jnp.sum(row_sq)

        # Per-tile partial sums live in sublanes 0/1/2 (lane-broadcast) of a
        # lane-dense (1, 8, 128) output block owned by this grid step.
        sub = jax.lax.broadcasted_iota(jnp.int32, (1, 8, 128), 1)
        blk = jnp.where(sub == 0, sum_feat,
              jnp.where(sub == 1, sum_class,
              jnp.where(sub == 2, sum_thresh, 0.0)))
        o_ref[...] = blk.astype(o_ref.dtype)

    return kernel


def loss_tree1_weight(pred, target, weight=WEIGHT):
    """pred = (logits_feat (N,Cf), logits_class (N,Cc), thresh (N,D))
       target = (tgt_feat (N,) int, tgt_class (N,) int, thresh_tgt (N,D))
       Returns a (1,)-shaped f32 array (matching the PyTorch module)."""
    logits_feat, logits_class, pred_thresh = pred
    tgt_feat, tgt_class, tgt_thresh = target

    n, c_feat = logits_feat.shape
    _, c_class = logits_class.shape
    _, d = pred_thresh.shape

    # Pack the two integer target columns into one (N, 2) int32 stream.
    tgt = jnp.stack([tgt_feat.astype(jnp.int32),
                     tgt_class.astype(jnp.int32)], axis=1)

    # ---- Generation-aware VMEM budget & tile sizing -------------------------
    try:
        vmem_phys = pltpu.get_tpu_info().vmem_capacity_bytes
    except Exception:
        vmem_phys = 64 * 1024 * 1024          # conservative (v7x-sized) fallback
    # <= ~48 MiB scoped on v7x (64 MiB physical), <= 64 MiB on v5e/v6e (128 MiB).
    vmem_limit = min((vmem_phys * 3) // 4, 64 * 1024 * 1024)

    def _itemsize(a):
        return jnp.dtype(a.dtype).itemsize

    # Sublane packing: f32/i32 -> 8 rows, bf16 -> 16, int8/fp8 -> 32.
    min_itemsize = min(_itemsize(logits_feat), _itemsize(logits_class),
                       _itemsize(pred_thresh), _itemsize(tgt_thresh), 4)
    align = 8 * max(1, 4 // min_itemsize)

    lane = 128
    bytes_per_row = (
        _round_up(c_feat, lane) * _itemsize(logits_feat)
        + _round_up(c_class, lane) * _itemsize(logits_class)
        + _round_up(2, lane) * 4                       # packed int32 targets
        + _round_up(d, lane) * _itemsize(pred_thresh)
        + _round_up(d, lane) * _itemsize(tgt_thresh))

    # Inputs are double-buffered; keep one block set to ~1/3 of the scoped limit.
    budget = vmem_limit // 3
    tile_n = max(align, _round_down(budget // bytes_per_row, align))
    tile_n = min(tile_n, _round_up(n, align))
    # Clamp the scoped limit so even the minimal tile still double-buffers.
    vmem_limit = max(vmem_limit, 2 * tile_n * bytes_per_row + (8 << 20))

    num_tiles = pl.cdiv(n, tile_n)
    needs_mask = (n % tile_n) != 0

    kernel = _make_kernel(n, tile_n, needs_mask)

    partials = pl.pallas_call(
        kernel,
        out_shape=jax.ShapeDtypeStruct((num_tiles, 8, 128), jnp.float32),
        grid=(num_tiles,),
        in_specs=[
            pl.BlockSpec((tile_n, c_feat), lambda i: (i, 0)),
            pl.BlockSpec((tile_n, c_class), lambda i: (i, 0)),
            pl.BlockSpec((tile_n, 2), lambda i: (i, 0)),
            pl.BlockSpec((tile_n, d), lambda i: (i, 0)),
            pl.BlockSpec((tile_n, d), lambda i: (i, 0)),
        ],
        out_specs=pl.BlockSpec((1, 8, 128), lambda i: (i, 0, 0)),
        compiler_params=pltpu.CompilerParams(
            dimension_semantics=("parallel",),
            vmem_limit_bytes=int(vmem_limit),
        ),
    )(logits_feat, logits_class, tgt, pred_thresh, tgt_thresh)

    # Fold the handful of per-tile partials and apply the constant scales
    # (the CE / MSE means and the module's weights) once, in the wrapper.
    sums = partials[:, :3, 0].sum(axis=0)              # (3,) f32
    w = float(weight)
    loss = ((w / n) * sums[0]
            + ((1.0 - w) / n) * sums[1]
            + (w / (n * d)) * sums[2])
    return loss.reshape(1).astype(jnp.float32)


def _reference(pred, target, weight=WEIGHT):
    """Pure-JAX reference for validation."""
    logits_feat, logits_class, pred_thresh = pred
    tgt_feat, tgt_class, tgt_thresh = target

    def ce(logits, tgt):
        logits = logits.astype(jnp.float32)
        lse = jax.scipy.special.logsumexp(logits, axis=-1)
        picked = jnp.take_along_axis(
            logits, tgt[:, None].astype(jnp.int32), axis=-1)[:, 0]
        return jnp.mean(lse - picked)

    l_f = ce(logits_feat, tgt_feat)
    l_c = ce(logits_class, tgt_class)
    l_t = jnp.mean((pred_thresh.astype(jnp.float32)
                    - tgt_thresh.astype(jnp.float32)) ** 2)
    return (weight * l_f + (1.0 - weight) * l_c + weight * l_t).reshape(1)


if __name__ == "__main__":
    key = jax.random.PRNGKey(0)
    k1, k2, k3, k4, k5, k6 = jax.random.split(key, 6)

    N, C_FEAT, C_CLASS, D = 8, 32, 16, 32

    logits_feat = jax.random.normal(k1, (N, C_FEAT), dtype=jnp.float32)
    logits_class = jax.random.normal(k2, (N, C_CLASS), dtype=jnp.float32)
    pred_thresh = jax.random.normal(k3, (N, D), dtype=jnp.float32)

    tgt_feat = jax.random.randint(k4, (N,), 0, C_FEAT, dtype=jnp.int32)
    tgt_class = jax.random.randint(k5, (N,), 0, C_CLASS, dtype=jnp.int32)
    tgt_thresh = jax.random.normal(k6, (N, D), dtype=jnp.float32)

    pred = (logits_feat, logits_class, pred_thresh)
    target = (tgt_feat, tgt_class, tgt_thresh)

    out = loss_tree1_weight(pred, target)
    jax.block_until_ready(out)

    ref = _reference(pred, target)
    assert out.shape == (1,), out.shape
    assert jnp.allclose(out, ref, rtol=1e-5, atol=1e-5), (out, ref)

    print("KERNEL_OK")
</pallas_src>

<mosaic_0001>
module attributes {stable_mosaic.version = 11 : i64} {
  func.func @kernel(%arg0: i32, %arg1: memref<8x32xf32, #tpu.memory_space<vmem>>, %arg2: memref<8x16xf32, #tpu.memory_space<vmem>>, %arg3: memref<8x2xi32, #tpu.memory_space<vmem>>, %arg4: memref<8x32xf32, #tpu.memory_space<vmem>>, %arg5: memref<8x32xf32, #tpu.memory_space<vmem>>, %arg6: memref<1x8x128xf32, #tpu.memory_space<vmem>>) attributes {dimension_semantics = [#tpu.dimension_semantics<parallel>], iteration_bounds = array<i64: 1>, scalar_prefetch = 0 : i64, scratch_operands = 0 : i64, tpu.core_type = #tpu.core_type<tc>, window_params = [{transform_indices = @transform_0, window_bounds = array<i64: 8, 32>}, {transform_indices = @transform_1, window_bounds = array<i64: 8, 16>}, {transform_indices = @transform_2, window_bounds = array<i64: 8, 2>}, {transform_indices = @transform_3, window_bounds = array<i64: 8, 32>}, {transform_indices = @transform_4, window_bounds = array<i64: 8, 32>}, {transform_indices = @transform_5, window_bounds = array<i64: 1, 8, 128>}]} {
    %c0 = arith.constant 0 : index
    %c0_0 = arith.constant 0 : index
    %0 = vector.load %arg3[%c0, %c0_0] : memref<8x2xi32, #tpu.memory_space<vmem>>, vector<8x2xi32>
    %1 = vector.extract_strided_slice %0 {offsets = [0, 0], sizes = [8, 1], strides = [1, 1]} : vector<8x2xi32> to vector<8x1xi32>
    %2 = vector.extract_strided_slice %0 {offsets = [0, 1], sizes = [8, 1], strides = [1, 1]} : vector<8x2xi32> to vector<8x1xi32>
    %c0_1 = arith.constant 0 : index
    %c0_2 = arith.constant 0 : index
    %3 = vector.load %arg1[%c0_1, %c0_2] : memref<8x32xf32, #tpu.memory_space<vmem>>, vector<8x32xf32>
    %cst = arith.constant dense<0xFF800000> : vector<8xf32>
    %4 = vector.multi_reduction <maximumf>, %3, %cst [1] : vector<8x32xf32> to vector<8xf32>
    %5 = vector.shape_cast %4 : vector<8xf32> to vector<8x1xf32>
    %6 = vector.broadcast %5 : vector<8x1xf32> to vector<8x32xf32>
    %7 = arith.subf %3, %6 : vector<8x32xf32>
    %8 = math.exp %7 : vector<8x32xf32>
    %cst_3 = arith.constant dense<0.000000e+00> : vector<8xf32>
    %9 = vector.multi_reduction <add>, %8, %cst_3 [1] : vector<8x32xf32> to vector<8xf32>
    %10 = vector.shape_cast %9 : vector<8xf32> to vector<8x1xf32>
    %11 = math.log %10 : vector<8x1xf32>
    %12 = tpu.iota {dimensions = array<i32: 1>} : vector<8x32xi32>
    %13 = vector.broadcast %1 : vector<8x1xi32> to vector<8x32xi32>
    %14 = arith.cmpi eq, %12, %13 : vector<8x32xi32>
    %cst_4 = arith.constant 0.000000e+00 : f32
    %15 = vector.broadcast %cst_4 : f32 to vector<8x32xf32>
    %16 = arith.select %14, %7, %15 : vector<8x32xi1>, vector<8x32xf32>
    %cst_5 = arith.constant dense<0.000000e+00> : vector<8xf32>
    %17 = vector.multi_reduction <add>, %16, %cst_5 [1] : vector<8x32xf32> to vector<8xf32>
    %18 = vector.shape_cast %17 : vector<8xf32> to vector<8x1xf32>
    %19 = arith.subf %11, %18 : vector<8x1xf32>
    %20 = vector.shape_cast %19 : vector<8x1xf32> to vector<1x8x1xf32>
    %cst_6 = arith.constant dense<0.000000e+00> : vector<1xf32>
    %21 = vector.multi_reduction <add>, %20, %cst_6 [1, 2] : vector<1x8x1xf32> to vector<1xf32>
    %22 = vector.shape_cast %21 : vector<1xf32> to vector<1x1x1xf32>
    %23 = vector.extract %22[0, 0, 0] : f32 from vector<1x1x1xf32>
    %c0_7 = arith.constant 0 : index
    %c0_8 = arith.constant 0 : index
    %24 = vector.load %arg2[%c0_7, %c0_8] : memref<8x16xf32, #tpu.memory_space<vmem>>, vector<8x16xf32>
    %cst_9 = arith.constant dense<0xFF800000> : vector<8xf32>
    %25 = vector.multi_reduction <maximumf>, %24, %cst_9 [1] : vector<8x16xf32> to vector<8xf32>
    %26 = vector.shape_cast %25 : vector<8xf32> to vector<8x1xf32>
    %27 = vector.broadcast %26 : vector<8x1xf32> to vector<8x16xf32>
    %28 = arith.subf %24, %27 : vector<8x16xf32>
    %29 = math.exp %28 : vector<8x16xf32>
    %cst_10 = arith.constant dense<0.000000e+00> : vector<8xf32>
    %30 = vector.multi_reduction <add>, %29, %cst_10 [1] : vector<8x16xf32> to vector<8xf32>
    %31 = vector.shape_cast %30 : vector<8xf32> to vector<8x1xf32>
    %32 = math.log %31 : vector<8x1xf32>
    %33 = tpu.iota {dimensions = array<i32: 1>} : vector<8x16xi32>
    %34 = vector.broadcast %2 : vector<8x1xi32> to vector<8x16xi32>
    %35 = arith.cmpi eq, %33, %34 : vector<8x16xi32>
    %cst_11 = arith.constant 0.000000e+00 : f32
    %36 = vector.broadcast %cst_11 : f32 to vector<8x16xf32>
    %37 = arith.select %35, %28, %36 : vector<8x16xi1>, vector<8x16xf32>
    %cst_12 = arith.constant dense<0.000000e+00> : vector<8xf32>
    %38 = vector.multi_reduction <add>, %37, %cst_12 [1] : vector<8x16xf32> to vector<8xf32>
    %39 = vector.shape_cast %38 : vector<8xf32> to vector<8x1xf32>
    %40 = arith.subf %32, %39 : vector<8x1xf32>
    %41 = vector.shape_cast %40 : vector<8x1xf32> to vector<1x8x1xf32>
    %cst_13 = arith.constant dense<0.000000e+00> : vector<1xf32>
    %42 = vector.multi_reduction <add>, %41, %cst_13 [1, 2] : vector<1x8x1xf32> to vector<1xf32>
    %43 = vector.shape_cast %42 : vector<1xf32> to vector<1x1x1xf32>
    %44 = vector.extract %43[0, 0, 0] : f32 from vector<1x1x1xf32>
    %c0_14 = arith.constant 0 : index
    %c0_15 = arith.constant 0 : index
    %45 = vector.load %arg4[%c0_14, %c0_15] : memref<8x32xf32, #tpu.memory_space<vmem>>, vector<8x32xf32>
    %c0_16 = arith.constant 0 : index
    %c0_17 = arith.constant 0 : index
    %46 = vector.load %arg5[%c0_16, %c0_17] : memref<8x32xf32, #tpu.memory_space<vmem>>, vector<8x32xf32>
    %47 = arith.subf %45, %46 : vector<8x32xf32>
    %48 = arith.mulf %47, %47 : vector<8x32xf32>
    %cst_18 = arith.constant dense<0.000000e+00> : vector<8xf32>
    %49 = vector.multi_reduction <add>, %48, %cst_18 [1] : vector<8x32xf32> to vector<8xf32>
    %50 = vector.shape_cast %49 : vector<8xf32> to vector<8x1xf32>
    %51 = vector.shape_cast %50 : vector<8x1xf32> to vector<1x8x1xf32>
    %cst_19 = arith.constant dense<0.000000e+00> : vector<1xf32>
    %52 = vector.multi_reduction <add>, %51, %cst_19 [1, 2] : vector<1x8x1xf32> to vector<1xf32>
    %53 = vector.shape_cast %52 : vector<1xf32> to vector<1x1x1xf32>
    %54 = vector.extract %53[0, 0, 0] : f32 from vector<1x1x1xf32>
    %55 = tpu.iota {dimensions = array<i32: 1>} : vector<1x8x128xi32>
    %c0_i32 = arith.constant 0 : i32
    %56 = vector.broadcast %c0_i32 : i32 to vector<1x8x128xi32>
    %57 = arith.cmpi eq, %55, %56 : vector<1x8x128xi32>
    %c1_i32 = arith.constant 1 : i32
    %58 = vector.broadcast %c1_i32 : i32 to vector<1x8x128xi32>
    %59 = arith.cmpi eq, %55, %58 : vector<1x8x128xi32>
    %c2_i32 = arith.constant 2 : i32
    %60 = vector.broadcast %c2_i32 : i32 to vector<1x8x128xi32>
    %61 = arith.cmpi eq, %55, %60 : vector<1x8x128xi32>
    %cst_20 = arith.constant 0.000000e+00 : f32
    %62 = vector.broadcast %54 : f32 to vector<1x8x128xf32>
    %63 = vector.broadcast %cst_20 : f32 to vector<1x8x128xf32>
    %64 = arith.select %61, %62, %63 : vector<1x8x128xi1>, vector<1x8x128xf32>
    %65 = vector.broadcast %44 : f32 to vector<1x8x128xf32>
    %66 = arith.select %59, %65, %64 : vector<1x8x128xi1>, vector<1x8x128xf32>
    %67 = vector.broadcast %23 : f32 to vector<1x8x128xf32>
    %68 = arith.select %57, %67, %66 : vector<1x8x128xi1>, vector<1x8x128xf32>
    %c0_21 = arith.constant 0 : index
    %c0_22 = arith.constant 0 : index
    %c0_23 = arith.constant 0 : index
    %69 = vector.load %arg6[%c0_21, %c0_22, %c0_23] : memref<1x8x128xf32, #tpu.memory_space<vmem>>, vector<1x8x128xf32>
    tpu.vector_store %arg6[%c0_21, %c0_22, %c0_23], %68 {strides = array<i32>} : memref<1x8x128xf32, #tpu.memory_space<vmem>>, vector<1x8x128xf32>,
    return
  }
  func.func @transform_0(%arg0: i32) -> (i32, i32) {
    %c0_i32 = arith.constant 0 : i32
    %c0_i32_0 = arith.constant 0 : i32
    return %arg0, %c0_i32 : i32, i32
  }
  func.func @transform_1(%arg0: i32) -> (i32, i32) {
    %c0_i32 = arith.constant 0 : i32
    %c0_i32_0 = arith.constant 0 : i32
    return %arg0, %c0_i32 : i32, i32
  }
  func.func @transform_2(%arg0: i32) -> (i32, i32) {
    %c0_i32 = arith.constant 0 : i32
    %c0_i32_0 = arith.constant 0 : i32
    return %arg0, %c0_i32 : i32, i32
  }
  func.func @transform_3(%arg0: i32) -> (i32, i32) {
    %c0_i32 = arith.constant 0 : i32
    %c0_i32_0 = arith.constant 0 : i32
    return %arg0, %c0_i32 : i32, i32
  }
  func.func @transform_4(%arg0: i32) -> (i32, i32) {
    %c0_i32 = arith.constant 0 : i32
    %c0_i32_0 = arith.constant 0 : i32
    return %arg0, %c0_i32 : i32, i32
  }
  func.func @transform_5(%arg0: i32) -> (i32, i32, i32) {
    %c0_i32 = arith.constant 0 : i32
    %c0_i32_0 = arith.constant 0 : i32
    %c0_i32_1 = arith.constant 0 : i32
    return %arg0, %c0_i32, %c0_i32_0 : i32, i32, i32
  }
}

</mosaic_0001>

<bundles_post_ra>
// kernel: tpu_custom_call.1
= control target key start
LH: loop header
LB: loop body
LE: loop exit
PB: predicated region body
PF: predicated region fallthrough
CT: control target
= control target key end

     0   :  { %10 = vsyncpa [#allocation3], 0  ;;  %s308_s0 = inlined_call_operand.vmem [shape: f32[8,32], index: 0, kind: input, shape index: {}]   ;;  %s309_s1 = inlined_call_operand.hbm [shape: f32[8,16], index: 1, kind: input, shape index: {}]   ;;  %s310_s2 = inlined_call_operand.vmem [shape: s32[8,2], index: 2, kind: input, shape index: {}]   ;;  %s311_s3 = inlined_call_operand.hbm [shape: f32[8,32], index: 3, kind: input, shape index: {}]   ;;  %s312_s4 = inlined_call_operand.vmem [shape: f32[8,32], index: 4, kind: input, shape index: {}]   ;;  %s313_s5 = inlined_call_operand.hbm [shape: f32[1,8,128], index: 5, kind: output, shape index: {}]  }
   0x1   :  { %11 = vsyncpa [#allocation6], 0 }
   0x2   :  { %12 = vsyncpa [#allocation4], 0  ;;  %s246_s18 = smov [#allocation2]   ;;  %s247_s20 = smov [#allocation5]  }
   0x3   :  { %s21_s19 = sshll.u32 %s246_s18, 4  ;;  %s33_s21 = sshll.u32 %s247_s20, 4  ;;  %s22_s19 = int_to_ptr.vmem [resolvable:$true] %s21_s19  ;;  %s34_s21 = int_to_ptr.vmem [resolvable:$true] %s33_s21 }
   0x4   :  { %s188_s22 = scalar_lea.vmem %s22_s19, 128  ;;  %p193_p1 = scmp.lt.s32.totalorder %s22_s19, %s22_s19 }
   0x5   :  { %p189_p0 = scmp.ne.s32.totalorder %s22_s19, %s188_s22  ;;  %p194_p2 = scmp.lt.s32.totalorder %s188_s22, %s188_s22 }
   0x7   :  { %p195_p3 = por %p194_p2, %p193_p1 }
   0x9   :  { %p196_p4 = pnand %p195_p3, %p189_p0 }
   0xb   :  { %199 = shalt.err (!%p196_p4)
}
   0xc   :  { %24 = dma.hbm_to_vmem [thread:$0]  %s309_s1, 128, %s22_s19, [#allocation3]  }
   0xd   :  { %s208_s25 = scalar_lea.vmem %s34_s21, 128  ;;  %p213_p6 = scmp.lt.s32.totalorder %s34_s21, %s34_s21 }
   0xe   :  { %p209_p5 = scmp.ne.s32.totalorder %s34_s21, %s208_s25  ;;  %p214_p7 = scmp.lt.s32.totalorder %s208_s25, %s208_s25 }
  0x10   :  { %p215_p8 = por %p214_p7, %p213_p6 }
  0x12   :  { %p216_p9 = pnand %p215_p8, %p209_p5 }
  0x14   :  { %219 = shalt.err (!%p216_p9)
}
  0x15   :  { %36 = dma.hbm_to_vmem [thread:$0]  %s311_s3, 128, %s34_s21, [#allocation6]  }
  0x16   :  { %240 = dma.done.wait [#allocation3], 128  }
  0x17   :  { %241 = vsyncadd [#allocation3], 4294967168 }
  0x18   :  { %242 = dma.done.wait [#allocation6], 128  }
  0x19   :  { %243 = vsyncadd [#allocation6], 4294967168  ;;  %v248_v0 = vmov 0   ;;  %v249_v1 = vmov 1   ;;  %vm47_vm0 = vcmask 261120   ;;  %v46_v2 = vld [vmem:[%s308_s0] sm:$0xff]  ;;  %v59_v13 = vlaneseq }
  0x1a   :  { %169 = vset.pattern.permute.xlu1 %v248_v0  ;;  %171 = vset.pattern.permute.xlu0 %v249_v1  ;;  %v81_v3 = vld [vmem:[#allocation2] sm:$0xff]  ;;  %vm82_vm1 = vcmask 130048   ;;  %v48_v5 = vsel %vm47_vm0, %v46_v2, -inf  ;;  %v113_v18 = vld [vmem:[#allocation5] sm:$0xff]  ;;  %vm70_vm4 = vcmask 7168   ;;  %s250_s7 = smov [#allocation7]  }
  0x1b   :  { %v45_v4 = vld [vmem:[%s310_s2] sm:$0xff]  ;;  %49 = vmax.xlane.f32.xlu0 %v48_v5  ;;  %v83_v6 = vsel %vm82_vm1, %v81_v3, -inf  ;;  %v60_v15 = vand.u32 127, %v59_v13  ;;  %s148_s8 = sshll.u32 %s250_s7, 4  ;;  %s149_s8 = int_to_ptr.vmem [resolvable:$true] %s148_s8 }
  0x1c   :  { %62 = vperm.xlu1 %169, %v45_v4   ;;  %v114_v19 = vld [vmem:[%s312_s4] sm:$0xff]  ;;  %s220_s9 = scalar_lea.vmem %s149_s8, 128  ;;  %p225_p11 = scmp.lt.s32.totalorder %s149_s8, %s149_s8 }
  0x1d   :  { %v115_v22 = vsub.f32 %v113_v18, %v114_v19  ;;  %p221_p10 = scmp.ne.s32.totalorder %s149_s8, %s220_s9  ;;  %p226_p12 = scmp.lt.s32.totalorder %s220_s9, %s220_s9 }
  0x1f   :  { %84 = vmax.xlane.f32.xlu0 %v83_v6  ;;  %v116_v27 = vmul.f32 %v115_v22, %v115_v22  ;;  %p227_p13 = por %p226_p12, %p225_p11 }
  0x20   :  { %170 = vset.pattern.permute.xlu1 %v249_v1  ;;  %v131_v1 = vshrl.u32 %v59_v13, 7 }
  0x21   :  { %95 = vperm.xlu1 %170, %v45_v4   ;;  %v117_v29 = vsel %vm47_vm0, %v116_v27, 0.0  ;;  %p228_p0 = pnand %p227_p13, %p221_p10 }
  0x22   :  { %vm134_vm5 = vcmp.eq.s32.totalorder %v131_v1, 2  ;;  %vm133_vm6 = vcmp.eq.s32.totalorder %v131_v1, 1  ;;  %vm132_vm7 = vcmp.eq.s32.totalorder %v131_v1, 0 }
  0x97   :  { %v63_v14 = vpop.permute.xlu1 %62 }
  0x98   :  { %vm64_vm2 = vcmp.eq.s32.totalorder %v60_v15, %v63_v14 }
  0x9c   :  { %v96_v17 = vpop.permute.xlu1 %95 }
  0x9d   :  { %vm97_vm3 = vcmp.eq.s32.totalorder %v60_v15, %v96_v17 }
  0xa4   :  { %v50_v7 = vpop.xlane.xlu0 %49 }
  0xa5   :  { %v51_v8 = vsub.f32 %v46_v2, %v50_v7 }
  0xa7   :  { %v52_v9 = vmul.f32 1.442695, %v51_v8  ;;  %v65_v21 = vsel %vm64_vm2, %v51_v8, 0.0 }
  0xa8   :  { %v85_v10 = vpop.xlane.xlu0 %84  ;;  %v66_v25 = vsel %vm47_vm0, %v65_v21, 0.0 }
  0xa9   :  { %172 = vpow2.f32 %v52_v9  ;;  %v86_v11 = vsub.f32 %v81_v3, %v85_v10 }
  0xab   :  { %v87_v12 = vmul.f32 1.442695, %v86_v11  ;;  %v98_v26 = vsel %vm97_vm3, %v86_v11, 0.0 }
  0xac   :  { %v99_v28 = vsel %vm82_vm1, %v98_v26, 0.0 }
  0xad   :  { %174 = vpow2.f32 %v87_v12 }
  0xb6   :  { %v173_v16 = vpop.eup %172 }
  0xb7   :  { %v54_v20 = vsel %vm47_vm0, %v173_v16, 0.0 }
  0xb8   :  { %55 = vadd.xlane.f32.xlu0 %v54_v20 }
  0xba   :  { %v175_v23 = vpop.eup %174 }
  0xbb   :  { %v89_v24 = vsel %vm82_vm1, %v175_v23, 0.0 }
  0xbc   :  { %90 = vadd.xlane.f32.xlu1 %v89_v24  ;;  %67 = vadd.xlane.f32.xlu0 %v66_v25 }
  0xc0   :  { %100 = vadd.xlane.f32.xlu0 %v99_v28 }
  0xc4   :  { %118 = vadd.xlane.f32.xlu0 %v117_v29 }
 0x141   :  { %v56_v30 = vpop.xlane.xlu0 %55 }
 0x142   :  { %176 = vlog2.f32 %v56_v30 }
 0x145   :  { %v91_v31 = vpop.xlane.xlu1 %90  ;;  %v68_v32 = vpop.xlane.xlu0 %67 }
 0x146   :  { %178 = vlog2.f32 %v91_v31 }
 0x149   :  { %v101_v37 = vpop.xlane.xlu0 %100 }
 0x14d   :  { %v119_v41 = vpop.xlane.xlu0 %118 }
 0x14e   :  { %v120_v43 = vsel %vm70_vm4, %v119_v41, 0.0 }
 0x14f   :  { %v177_v33 = vpop.eup %176 }
 0x150   :  { %v58_v34 = vmul.f32 0.6931472, %v177_v33 }
 0x152   :  { %v69_v35 = vsub.f32 %v58_v34, %v68_v32 }
 0x153   :  { %v179_v36 = vpop.eup %178 }
 0x154   :  { %v93_v38 = vmul.f32 0.6931472, %v179_v36  ;;  %v71_v39 = vsel %vm70_vm4, %v69_v35, 0.0 }
 0x155   :  { %72 = vadd.xlane.f32.xlu0 %v71_v39 }
 0x156   :  { %v102_v40 = vsub.f32 %v93_v38, %v101_v37 }
 0x158   :  { %v103_v42 = vsel %vm70_vm4, %v102_v40, 0.0 }
 0x159   :  { %104 = vadd.xlane.f32.xlu0 %v103_v42 }
 0x15d   :  { %121 = vadd.xlane.f32.xlu0 %v120_v43 }
 0x1de   :  { %v73_v44 = vpop.xlane.xlu0 %72 }
 0x1df   :  { %v74_v45 = vrot.slane %v73_v44, 4 }
 0x1e1   :  { %v75_v46 = vadd.f32 %v74_v45, %v73_v44 }
 0x1e2   :  { %v105_v47 = vpop.xlane.xlu0 %104 }
 0x1e3   :  { %v76_v48 = vrot.slane %v75_v46, 2  ;;  %v106_v49 = vrot.slane %v105_v47, 4 }
 0x1e5   :  { %v107_v50 = vadd.f32 %v106_v49, %v105_v47  ;;  %v77_v51 = vadd.f32 %v76_v48, %v75_v46 }
 0x1e6   :  { %v122_v52 = vpop.xlane.xlu0 %121 }
 0x1e7   :  { %v108_v53 = vrot.slane %v107_v50, 2  ;;  %v123_v54 = vrot.slane %v122_v52, 4  ;;  %v78_v55 = vrot.slane %v77_v51, 1 }
 0x1e9   :  { %v124_v56 = vadd.f32 %v123_v54, %v122_v52  ;;  %v79_v57 = vadd.f32 %v78_v55, %v77_v51  ;;  %v109_v58 = vadd.f32 %v108_v53, %v107_v50 }
 0x1eb   :  { %v125_v59 = vrot.slane %v124_v56, 2  ;;  %158 = vpush %v79_v57  ;;  %v110_v60 = vrot.slane %v109_v58, 1 }
 0x1ed   :  { %v126_v61 = vadd.f32 %v125_v59, %v124_v56  ;;  %v111_v62 = vadd.f32 %v110_v60, %v109_v58 }
 0x1ef   :  { %160 = vpush %v111_v62  ;;  %v127_v63 = vrot.slane %v126_v61, 1 }
 0x1f1   :  { %v128_v0 = vadd.f32 %v127_v63, %v126_v61 }
 0x1f3   :  { %162 = vpush %v128_v0 }
 0x21c   :  { %s159_s3 = spop %158 }
 0x21d   :  { %v139_v5 = vstv %s159_s3 }
 0x220   :  { %s161_s4 = spop %160 }
 0x221   :  { %v137_v3 = vstv %s161_s4 }
 0x224   :  { %s163_s6 = spop %162 }
 0x225   :  { %v135_v2 = vstv %s163_s6 }
 0x226   :  { %v136_v4 = vsel %vm134_vm5, %v135_v2, 0.0 }
 0x227   :  { %v138_v6 = vsel %vm133_vm6, %v137_v3, %v136_v4 }
 0x228   :  { %v140_v7 = vsel %vm132_vm7, %v139_v5, %v138_v6 }
 0x229   :  { %141 = vst [vmem:[#allocation7] sm:$0xff] %v140_v7 }
 0x22a   :  { %231 = shalt.err (!%p228_p0)
}
 0x22b   :  { %151 = dma.vmem_to_hbm [thread:$0]  %s149_s8, 128, %s313_s5, [#allocation4]  }
 0x22c   :  { %244 = dma.done.wait [#allocation4], 128  }
 0x22d   :  { %245 = vsyncadd [#allocation4], 4294967168 }
 0x22e   :  { %155 = vsyncpa [#allocation3], 1 }
 0x22f   :  { %156 = vsyncpa [#allocation6], 1 }
 0x230   :  { %157 = vsyncpa [#allocation4], 1 }

</bundles_post_ra>
